<compile_context>
chip_gen: v5e
topology: v5e:2x2
jax: 0.10.0
libtpu: 0.0.40
codegen_flags: <defaults>
</compile_context>

<pallas_src>
import jax
import jax.numpy as jnp
from jax.experimental import pallas as pl
from jax.experimental.pallas import tpu as pltpu

IN_FEATURES = 4
OUT_FEATURES = 128

# Anything up to this many rows goes through the single-invocation path:
# x + out for 4096 rows is ~4 MiB of VMEM (full-array blocks, no pipeline
# prologue/epilogue or per-step bookkeeping).
_GRIDFREE_MAX = 4096

# Rows per grid step on the tiled (large rollout) path. Double-buffered
# working set: x lane-padded to 128 lanes -> 2 MiB x2, out 2 MiB x2, W/bias
# tiny  =>  ~8.5 MiB total, safe on v5e / v6e / v7x scoped VMEM defaults.
_BATCH_TILE = 4096


def _linear_kernel(x_ref, wt_ref, b_ref, o_ref):
    # Tiles: x (Bt, 4), wt (4, 128), b (1, 128), o (Bt, 128).
    # K=4 is far too narrow to feed the MXU usefully and the MXU has slack
    # anyway, so the contraction is 4 lane-broadcast multiply-adds on the
    # VPU; the [Bt, 128] f32 accumulator stays in vregs the whole time and
    # is cast only at the store.
    x = x_ref[...].astype(jnp.float32)
    wt = wt_ref[...].astype(jnp.float32)
    acc = b_ref[...].astype(jnp.float32) + x[:, 0:1] * wt[0:1, :]
    for k in range(1, IN_FEATURES):
        acc = acc + x[:, k:k + 1] * wt[k:k + 1, :]
    o_ref[...] = acc.astype(o_ref.dtype)


def prepare_params(weight, bias):
    """One-time conversion from PyTorch Linear layout (at init, NOT per call).

    weight: [128, 4] (out, in)  ->  wt: [4, 128] (lane-dense output dim)
    bias:   [128]               ->  b2: [1, 128]
    """
    return weight.T, bias.reshape(1, OUT_FEATURES)


def policy_forward(x, wt, b2, out_dtype=None):
    """Linear(4, 128) forward.

    x:  [B, 4]               observations
    wt: [4, 128]             pre-transposed weight
    b2: [1, 128]             bias
    out_dtype: optional narrower output dtype (e.g. jnp.bfloat16) to halve
               HBM writeback; accumulation is always float32.
    """
    B = x.shape[0]
    out_dtype = x.dtype if out_dtype is None else out_dtype

    if B <= _GRIDFREE_MAX:
        # Grid-free path: full-array VMEM blocks, single kernel invocation,
        # zero pipeline machinery. Ideal for REINFORCE-style small batches.
        return pl.pallas_call(
            _linear_kernel,
            out_shape=jax.ShapeDtypeStruct((B, OUT_FEATURES), out_dtype),
            in_specs=[
                pl.BlockSpec(memory_space=pltpu.MemorySpace.VMEM),
                pl.BlockSpec(memory_space=pltpu.MemorySpace.VMEM),
                pl.BlockSpec(memory_space=pltpu.MemorySpace.VMEM),
            ],
            out_specs=pl.BlockSpec(memory_space=pltpu.MemorySpace.VMEM),
        )(x, wt, b2)

    # Batched-rollout path: tile the batch dim, keep W / bias resident, and
    # produce the exact (B, 128) output directly -- no wrapper pad / slice.
    # When _BATCH_TILE does not divide B, the edge block computes on
    # unspecified OOB rows, which is safe for this per-row op because their
    # writes are masked (do NOT fuse a cross-row reduction into this path).
    # TODO(synk): on v7x, pltpu.CORE_PARALLEL on this axis (or pl.core_map)
    # would split the batch grid across its 2 TensorCores; "parallel" vs
    # "arbitrary" is measured-neutral on v5e/v6e, so we keep the portable
    # setting here.
    return pl.pallas_call(
        _linear_kernel,
        out_shape=jax.ShapeDtypeStruct((B, OUT_FEATURES), out_dtype),
        grid=(pl.cdiv(B, _BATCH_TILE),),
        in_specs=[
            pl.BlockSpec((_BATCH_TILE, IN_FEATURES), lambda i: (i, 0)),
            pl.BlockSpec((IN_FEATURES, OUT_FEATURES), lambda i: (0, 0)),
            pl.BlockSpec((1, OUT_FEATURES), lambda i: (0, 0)),
        ],
        out_specs=pl.BlockSpec((_BATCH_TILE, OUT_FEATURES), lambda i: (i, 0)),
        compiler_params=pltpu.CompilerParams(
            dimension_semantics=("parallel",)),
    )(x, wt, b2)


if __name__ == "__main__":
    key = jax.random.PRNGKey(0)
    k_x, k_w, k_b, k_xl = jax.random.split(key, 4)

    # Deterministic parameter init mimicking PyTorch Linear's
    # uniform(-1/sqrt(4), 1/sqrt(4)), in PyTorch layout, converted once.
    bound = 1.0 / jnp.sqrt(jnp.float32(IN_FEATURES))
    weight = jax.random.uniform(
        k_w, (OUT_FEATURES, IN_FEATURES), minval=-bound, maxval=bound,
        dtype=jnp.float32)
    bias = jax.random.uniform(
        k_b, (OUT_FEATURES,), minval=-bound, maxval=bound, dtype=jnp.float32)
    wt, b2 = prepare_params(weight, bias)

    # Small batch of CartPole-style 4-dim observations -> grid-free path.
    B = 8
    x = jax.random.normal(k_x, (B, IN_FEATURES), dtype=jnp.float32)
    out = policy_forward(x, wt, b2)
    jax.block_until_ready(out)
    ref = x @ weight.T + bias
    assert out.shape == (B, OUT_FEATURES)
    assert jnp.allclose(out, ref, atol=1e-5, rtol=1e-5)

    # Vectorized-rollout batch with an uneven tail -> tiled path; exercises
    # the masked partial edge block (no wrapper pad / slice copies).
    BL = _GRIDFREE_MAX + 904  # 5000 rows => grid of 2, second block partial
    xl = jax.random.normal(k_xl, (BL, IN_FEATURES), dtype=jnp.float32)
    out_l = policy_forward(xl, wt, b2)
    jax.block_until_ready(out_l)
    ref_l = xl @ weight.T + bias
    assert out_l.shape == (BL, OUT_FEATURES)
    assert jnp.allclose(out_l, ref_l, atol=1e-5, rtol=1e-5)

    # TODO(synk): the downstream softmax / Categorical sampling of REINFORCE
    # lives outside this module's forward(); fusing it into this pallas_call
    # (consuming the [B,128] logits in VMEM) is the next big win, since the
    # standalone linear is launch-bound at small B.
    print("KERNEL_OK")
</pallas_src>

<mosaic_0001>
module attributes {stable_mosaic.version = 11 : i64} {
  func.func @_linear_kernel(%arg0: memref<8x4xf32, #tpu.memory_space<vmem>>, %arg1: memref<4x128xf32, #tpu.memory_space<vmem>>, %arg2: memref<1x128xf32, #tpu.memory_space<vmem>>, %arg3: memref<8x128xf32, #tpu.memory_space<vmem>>) attributes {dimension_semantics = [], scalar_prefetch = 0 : i64, scratch_operands = 0 : i64, tpu.core_type = #tpu.core_type<tc>} {
    %c0 = arith.constant 0 : index
    %c0_0 = arith.constant 0 : index
    %0 = vector.load %arg0[%c0, %c0_0] : memref<8x4xf32, #tpu.memory_space<vmem>>, vector<8x4xf32>
    %c0_1 = arith.constant 0 : index
    %c0_2 = arith.constant 0 : index
    %1 = vector.load %arg1[%c0_1, %c0_2] : memref<4x128xf32, #tpu.memory_space<vmem>>, vector<4x128xf32>
    %c0_3 = arith.constant 0 : index
    %c0_4 = arith.constant 0 : index
    %2 = vector.load %arg2[%c0_3, %c0_4] : memref<1x128xf32, #tpu.memory_space<vmem>>, vector<1x128xf32>
    %3 = vector.extract_strided_slice %0 {offsets = [0, 0], sizes = [8, 1], strides = [1, 1]} : vector<8x4xf32> to vector<8x1xf32>
    %4 = vector.extract_strided_slice %1 {offsets = [0, 0], sizes = [1, 128], strides = [1, 1]} : vector<4x128xf32> to vector<1x128xf32>
    %5 = vector.broadcast %3 : vector<8x1xf32> to vector<8x128xf32>
    %6 = vector.broadcast %4 : vector<1x128xf32> to vector<8x128xf32>
    %7 = arith.mulf %5, %6 : vector<8x128xf32>
    %8 = vector.broadcast %2 : vector<1x128xf32> to vector<8x128xf32>
    %9 = arith.addf %8, %7 : vector<8x128xf32>
    %10 = vector.extract_strided_slice %0 {offsets = [0, 1], sizes = [8, 1], strides = [1, 1]} : vector<8x4xf32> to vector<8x1xf32>
    %11 = vector.extract_strided_slice %1 {offsets = [1, 0], sizes = [1, 128], strides = [1, 1]} : vector<4x128xf32> to vector<1x128xf32>
    %12 = vector.broadcast %10 : vector<8x1xf32> to vector<8x128xf32>
    %13 = vector.broadcast %11 : vector<1x128xf32> to vector<8x128xf32>
    %14 = arith.mulf %12, %13 : vector<8x128xf32>
    %15 = arith.addf %9, %14 : vector<8x128xf32>
    %16 = vector.extract_strided_slice %0 {offsets = [0, 2], sizes = [8, 1], strides = [1, 1]} : vector<8x4xf32> to vector<8x1xf32>
    %17 = vector.extract_strided_slice %1 {offsets = [2, 0], sizes = [1, 128], strides = [1, 1]} : vector<4x128xf32> to vector<1x128xf32>
    %18 = vector.broadcast %16 : vector<8x1xf32> to vector<8x128xf32>
    %19 = vector.broadcast %17 : vector<1x128xf32> to vector<8x128xf32>
    %20 = arith.mulf %18, %19 : vector<8x128xf32>
    %21 = arith.addf %15, %20 : vector<8x128xf32>
    %22 = vector.extract_strided_slice %0 {offsets = [0, 3], sizes = [8, 1], strides = [1, 1]} : vector<8x4xf32> to vector<8x1xf32>
    %23 = vector.extract_strided_slice %1 {offsets = [3, 0], sizes = [1, 128], strides = [1, 1]} : vector<4x128xf32> to vector<1x128xf32>
    %24 = vector.broadcast %22 : vector<8x1xf32> to vector<8x128xf32>
    %25 = vector.broadcast %23 : vector<1x128xf32> to vector<8x128xf32>
    %26 = arith.mulf %24, %25 : vector<8x128xf32>
    %27 = arith.addf %21, %26 : vector<8x128xf32>
    %c0_5 = arith.constant 0 : index
    %c0_6 = arith.constant 0 : index
    %28 = vector.load %arg3[%c0_5, %c0_6] : memref<8x128xf32, #tpu.memory_space<vmem>>, vector<8x128xf32>
    tpu.vector_store %arg3[%c0_5, %c0_6], %27 {strides = array<i32>} : memref<8x128xf32, #tpu.memory_space<vmem>>, vector<8x128xf32>,
    return
  }
}

</mosaic_0001>

<bundles_post_ra>
// kernel: tpu_custom_call.1
= control target key start
LH: loop header
LB: loop body
LE: loop exit
PB: predicated region body
PF: predicated region fallthrough
CT: control target
= control target key end

     0   :  { %v104_v1 = vmov 0   ;;  %v105_v2 = vmov 2   ;;  %s141_s0 = inlined_call_operand.vmem [shape: f32[8,4], index: 0, kind: input, shape index: {}]   ;;  %s142_s1 = inlined_call_operand.vmem [shape: f32[4,128], index: 1, kind: input, shape index: {}]   ;;  %s143_s2 = inlined_call_operand.vmem [shape: f32[1,128], index: 2, kind: input, shape index: {}]   ;;  %s144_s3 = inlined_call_operand.hbm [shape: f32[8,128], index: 3, kind: output, shape index: {}]  }
   0x1   :  { %v15_v0 = vld [vmem:[%s141_s0] sm:$0xff]  ;;  %72 = vset.pattern.permute.xlu0 %v104_v1  ;;  %74 = vset.pattern.permute.xlu1 %v105_v2 }
   0x2   :  { %20 = vperm.xlu0 %72, %v15_v0   ;;  %37 = vperm.xlu1 %74, %v15_v0  }
   0x3   :  { %8 = vsyncpa [#allocation3], 0  ;;  %v106_v3 = vmov 1   ;;  %v107_v4 = vmov 3   ;;  %v16_v5 = vld [vmem:[%s142_s1] sm:$0xf] }
   0x4   :  { %v23_v8 = vperm.slane %v16_v5, 0  ;;  %v77_v9 = vld [vmem:[%s143_s2] ss:$0 sm:$0xff]  ;;  %v33_v11 = vperm.slane %v16_v5, 1  ;;  %v40_v12 = vperm.slane %v16_v5, 2  ;;  %v47_v13 = vperm.slane %v16_v5, 3 }
   0x5   :  { %s108_s17 = smov [#allocation2]   ;;  %s58_s20 = sshll.u32 %s144_s3, 4  ;;  %s59_s20 = int_to_ptr.hbm [resolvable:$true] %s58_s20 }
   0x6   :  { %s56_s1 = sshll.u32 %s108_s17, 4  ;;  %s57_s1 = int_to_ptr.vmem [resolvable:$true] %s56_s1 }
   0xa   :  { %73 = vset.pattern.permute.xlu0 %v106_v3  ;;  %75 = vset.pattern.permute.xlu1 %v107_v4 }
   0xb   :  { %30 = vperm.xlu0 %73, %v15_v0   ;;  %44 = vperm.xlu1 %75, %v15_v0  }
  0x13   :  { %76 = vset.pattern.permute.xlu0 %v107_v4 }
  0x74   :  { %v21_v6 = vpop.permute.xlu0 %20  ;;  %v38_v7 = vpop.permute.xlu1 %37 }
  0x75   :  { %v24_v10 = vmul.f32 %v23_v8, %v21_v6  ;;  %v41_v18 = vmul.f32 %v40_v12, %v38_v7 }
  0x77   :  { %v28_v16 = vadd.f32 %v77_v9, %v24_v10 }
  0x7d   :  { %v31_v14 = vpop.permute.xlu0 %30  ;;  %v45_v15 = vpop.permute.xlu1 %44 }
  0x7e   :  { %v34_v17 = vmul.f32 %v33_v11, %v31_v14  ;;  %v48_v20 = vmul.f32 %v47_v13, %v45_v15 }
  0x80   :  { %v35_v19 = vadd.f32 %v34_v17, %v28_v16 }
  0x82   :  { %v42_v21 = vadd.f32 %v41_v18, %v35_v19 }
  0x84   :  { %v49_v22 = vadd.f32 %v48_v20, %v42_v21 }
  0x86   :  { %50 = vst [vmem:[#allocation2] sm:$0xff] %v49_v22 }
  0x87   :  { %61 = dma.vmem_to_hbm [thread:$0]  %s57_s1, 128, %s59_s20, [#allocation3]  }
  0x88   :  { %102 = dma.done.wait [#allocation3], 128  }
  0x89   :  { %103 = vsyncadd [#allocation3], 4294967168 }
  0x8a   :  { %66 = vsyncpa [#allocation3], 1 }

</bundles_post_ra>
